<compile_context>
chip_gen: v5e
topology: v5e:2x2
jax: 0.10.0
libtpu: 0.0.40
codegen_flags: <defaults>
</compile_context>

<pallas_src>
import functools

import jax
import jax.numpy as jnp
import numpy as np
from jax.experimental import pallas as pl
from jax.experimental.pallas import tpu as pltpu

NUM_SWEEPS = 4  # zero-temperature relaxation sweeps (exact after 1 sweep for gamma=0)


def _ising_kernel(theta_t_ref, jsym_ref, lmd_ref, off_ref, out_ref):
    # theta_t_ref: (N, TILE_B) f32 VMEM  -- spins on sublanes, batch on lanes
    # jsym_ref:    (N, N)     bf16 VMEM  -- triu(gamma,1) + its transpose
    # lmd_ref / off_ref: (1, 1) f32 SMEM scalars
    # out_ref:     (1, TILE_B) f32 VMEM  -- lane-dense output row (unmasked vst)
    h = theta_t_ref[...]                                      # (N, TB) f32
    jsym = jsym_ref[...]                                      # (N, N)  bf16

    # Initial spins: exact ground state of the field-only problem.
    s = jnp.where(h > 0, -1.0, 1.0).astype(jnp.float32)       # (N, TB)

    # Zero-temperature greedy sweeps (synchronous single-spin updates).
    # One bf16 MXU matmul per sweep; the last product is reused for the energy.
    js = jnp.dot(jsym, s.astype(jnp.bfloat16),
                 preferred_element_type=jnp.float32)          # (N, TB) f32
    for _ in range(NUM_SWEEPS):
        s = jnp.where(h + js > 0, -1.0, 1.0).astype(jnp.float32)
        js = jnp.dot(jsym, s.astype(jnp.bfloat16),
                     preferred_element_type=jnp.float32)

    # Ising energy per batch column:
    #   E = sum_i h_i s_i + s^T U s,  with  s^T U s = 0.5 * s^T (U + U^T) s.
    energy = jnp.sum(h * s + 0.5 * s * js, axis=0, keepdims=True)  # (1, TB)

    out_ref[...] = lmd_ref[0, 0] * energy + off_ref[0, 0]


def _round_up(x: int, m: int) -> int:
    return ((x + m - 1) // m) * m


def _pick_tile_b(batch: int) -> int:
    # Lane-dense tiles (multiples of 128), few and fat:
    #   B <= 128        -> one step (single-TC v5e/v6e pay one fixed cost)
    #   128 < B <= 4096 -> exactly two "parallel" steps (one per v7x TensorCore)
    #   larger          -> 2048-lane tiles (measured v6e HBM-roofline sweet spot)
    if batch <= 128:
        return 128
    if batch <= 4096:
        return _round_up(batch, 256) // 2
    return 2048


@functools.partial(jax.jit, static_argnames=("tile_b",))
def full_ising_forward(thetas, gamma, lmd, offset, *, tile_b=None):
    """thetas: (B, N) f32, gamma: (N, N) f32, lmd/offset: (1,1) f32 -> (B,) f32."""
    B, N = thetas.shape
    if tile_b is None:
        tile_b = _pick_tile_b(B)
    assert tile_b % 128 == 0
    b_pad = _round_up(B, tile_b)
    grid_b = b_pad // tile_b

    # One-time parameter transform (weight prep): strict-upper couplings,
    # symmetrized, cast to bf16 for the MXU. Spins are exactly +-1 in bf16, so
    # only nonzero gamma is perturbed (~1e-3 rel); gamma == 0 stays exact.
    upper = jnp.triu(gamma, k=1)
    j_sym = (upper + upper.T).astype(jnp.bfloat16)             # (N, N), zero diag

    # Pad batch to a lane multiple and put batch on the lane axis.  The pad +
    # transpose feeding operand 0 is flagged fusable into the pallas_call
    # (allow_input_fusion) so XLA does not keep a separate HBM pass for it.
    theta_t = jnp.pad(thetas.astype(jnp.float32),
                      ((0, b_pad - B), (0, 0))).T              # (N, b_pad)

    # Derived VMEM budget (v7x has only 64 MiB physical): double-buffered
    # theta tile + padded output row + coupling matrix, with 4x headroom for
    # compiler-internal scratch.
    theta_tile_bytes = _round_up(N, 8) * tile_b * 4
    out_tile_bytes = 8 * tile_b * 4                            # (1, tb) pads to 8 sublanes
    jsym_bytes = _round_up(N, 16) * _round_up(N, 128) * 2
    buf_bytes = 2 * (theta_tile_bytes + out_tile_bytes + jsym_bytes)
    vmem_limit = min(64 * 1024 * 1024, max(4 * 1024 * 1024, 4 * buf_bytes))

    cost = pl.CostEstimate(
        flops=2 * (NUM_SWEEPS + 1) * N * N * b_pad,
        transcendentals=0,
        bytes_accessed=4 * (b_pad * N + b_pad) + 2 * N * N,
    )

    out = pl.pallas_call(
        _ising_kernel,
        out_shape=jax.ShapeDtypeStruct((1, b_pad), jnp.float32),
        grid_spec=pltpu.PrefetchScalarGridSpec(
            num_scalar_prefetch=0,
            grid=(grid_b,),
            in_specs=[
                pl.BlockSpec((N, tile_b), lambda i: (0, i)),   # theta^T tile
                # Shared couplings: constant block index -> fetched once.
                # TODO(synk): for large N use pipeline_mode=pl.Buffered(1) and
                # K-tile the (N, N) matrix (matters on v7x's 64 MiB VMEM).
                pl.BlockSpec((N, N), lambda i: (0, 0)),
                pl.BlockSpec(memory_space=pltpu.SMEM),         # lmd scalar
                pl.BlockSpec(memory_space=pltpu.SMEM),         # offset scalar
            ],
            out_specs=pl.BlockSpec((1, tile_b), lambda i: (0, i)),  # lane-dense row
        ),
        compiler_params=pltpu.CompilerParams(
            dimension_semantics=("parallel",),
            vmem_limit_bytes=vmem_limit,
            allow_input_fusion=[True, False, False, False],
        ),
        cost_estimate=cost,
    )(theta_t, j_sym, lmd, offset)
    return out[0, :B]


def _greedy_reference(thetas, gamma, lmd, offset):
    """Pure-JAX reference of the same greedy relaxation (mirrors bf16 numerics)."""
    upper = jnp.triu(gamma, k=1)
    j_bf16 = (upper + upper.T).astype(jnp.bfloat16)
    h = thetas.astype(jnp.float32)

    def js_of(s):
        # s @ J_sym == (J_sym @ s^T)^T for symmetric J_sym.
        return jax.lax.dot_general(
            s.astype(jnp.bfloat16), j_bf16,
            (((1,), (0,)), ((), ())),
            preferred_element_type=jnp.float32)

    s = jnp.where(h > 0, -1.0, 1.0).astype(jnp.float32)
    js = js_of(s)
    for _ in range(NUM_SWEEPS):
        s = jnp.where(h + js > 0, -1.0, 1.0).astype(jnp.float32)
        js = js_of(s)
    e = jnp.sum(h * s + 0.5 * s * js, axis=1)
    return lmd * e + offset


if __name__ == "__main__":
    key = jax.random.PRNGKey(0)
    k_theta, k_gamma, k_ragged = jax.random.split(key, 3)

    N = 16                 # sizeAnnealModel (number of spins)
    lambda_init = 1.5
    offset_init = 0.25
    lmd = jnp.full((1, 1), lambda_init, dtype=jnp.float32)       # self.lmd
    offset = jnp.full((1, 1), offset_init, dtype=jnp.float32)    # self.offset

    # Case 1: B=256 (two fat 128-lane parallel tiles), gamma == 0 -> exact
    # ground state: E0_b = -sum_i |theta_b,i|.
    B = 256
    thetas = jax.random.normal(k_theta, (B, N), dtype=jnp.float32)
    gamma0 = jnp.zeros((N, N), dtype=jnp.float32)                # IsingLayer init
    out0 = jax.block_until_ready(full_ising_forward(thetas, gamma0, lmd, offset))
    expected0 = lambda_init * (-jnp.sum(jnp.abs(thetas), axis=1)) + offset_init
    np.testing.assert_allclose(np.asarray(out0), np.asarray(expected0),
                               rtol=1e-5, atol=1e-5)

    # Case 2: nonzero gamma -> check against the pure-JAX greedy relaxation with
    # the same bf16-coupling numerics (SA itself is stochastic/CPU).
    gamma1 = 0.1 * jax.random.normal(k_gamma, (N, N), dtype=jnp.float32)
    out1 = jax.block_until_ready(full_ising_forward(thetas, gamma1, lmd, offset))
    expected1 = _greedy_reference(thetas, gamma1, lambda_init, offset_init)
    np.testing.assert_allclose(np.asarray(out1), np.asarray(expected1),
                               rtol=1e-3, atol=1e-3)

    # Case 3: ragged batch (exercises the pad-to-lane-multiple path).
    B2 = 200
    thetas2 = jax.random.normal(k_ragged, (B2, N), dtype=jnp.float32)
    out2 = jax.block_until_ready(full_ising_forward(thetas2, gamma1, lmd, offset))
    expected2 = _greedy_reference(thetas2, gamma1, lambda_init, offset_init)
    np.testing.assert_allclose(np.asarray(out2), np.asarray(expected2),
                               rtol=1e-3, atol=1e-3)

    print("KERNEL_OK")
</pallas_src>

<mosaic_0001>
module attributes {stable_mosaic.version = 11 : i64} {
  func.func @_ising_kernel(%arg0: i32, %arg1: memref<16x128xf32, #tpu.memory_space<vmem>>, %arg2: memref<16x16xbf16, #tpu.memory_space<vmem>>, %arg3: memref<1x1xf32, #tpu.memory_space<smem>>, %arg4: memref<1x1xf32, #tpu.memory_space<smem>>, %arg5: memref<1x128xf32, #tpu.memory_space<vmem>>) attributes {dimension_semantics = [#tpu.dimension_semantics<parallel>], iteration_bounds = array<i64: 2>, scalar_prefetch = 0 : i64, scratch_operands = 0 : i64, tpu.core_type = #tpu.core_type<tc>, window_params = [{transform_indices = @transform_0, window_bounds = array<i64: 16, 128>}, {pipeline_mode = #tpu.pipeline_mode<synchronous>, transform_indices = @transform_1, window_bounds = array<i64: 16, 16>}, {transform_indices = @transform_2, window_bounds = array<i64: 1, 1>}, {transform_indices = @transform_3, window_bounds = array<i64: 1, 1>}, {transform_indices = @transform_4, window_bounds = array<i64: 1, 128>}]} {
    %c0 = arith.constant 0 : index
    %c0_0 = arith.constant 0 : index
    %0 = vector.load %arg1[%c0, %c0_0] : memref<16x128xf32, #tpu.memory_space<vmem>>, vector<16x128xf32>
    %c0_1 = arith.constant 0 : index
    %c0_2 = arith.constant 0 : index
    %1 = vector.load %arg2[%c0_1, %c0_2] : memref<16x16xbf16, #tpu.memory_space<vmem>>, vector<16x16xbf16>
    %cst = arith.constant 0.000000e+00 : f32
    %2 = vector.broadcast %cst : f32 to vector<16x128xf32>
    %3 = arith.cmpf ogt, %0, %2 : vector<16x128xf32>
    %cst_3 = arith.constant -1.000000e+00 : f32
    %cst_4 = arith.constant 1.000000e+00 : f32
    %4 = vector.broadcast %cst_3 : f32 to vector<16x128xf32>
    %5 = vector.broadcast %cst_4 : f32 to vector<16x128xf32>
    %6 = arith.select %3, %4, %5 : vector<16x128xi1>, vector<16x128xf32>
    %7 = arith.truncf %6 : vector<16x128xf32> to vector<16x128xbf16>
    %cst_5 = arith.constant dense<0.000000e+00> : vector<16x128xf32>
    %8 = tpu.matmul %1, %7, %cst_5 {dimension_numbers = #tpu.dot_dimension_numbers<[1], [0], [0], [1], [0, 0, 1, 1], [], []>} : vector<16x16xbf16>, vector<16x128xbf16>, vector<16x128xf32> -> vector<16x128xf32>
    %9 = arith.addf %0, %8 : vector<16x128xf32>
    %cst_6 = arith.constant 0.000000e+00 : f32
    %10 = vector.broadcast %cst_6 : f32 to vector<16x128xf32>
    %11 = arith.cmpf ogt, %9, %10 : vector<16x128xf32>
    %cst_7 = arith.constant -1.000000e+00 : f32
    %cst_8 = arith.constant 1.000000e+00 : f32
    %12 = vector.broadcast %cst_7 : f32 to vector<16x128xf32>
    %13 = vector.broadcast %cst_8 : f32 to vector<16x128xf32>
    %14 = arith.select %11, %12, %13 : vector<16x128xi1>, vector<16x128xf32>
    %15 = arith.truncf %14 : vector<16x128xf32> to vector<16x128xbf16>
    %cst_9 = arith.constant dense<0.000000e+00> : vector<16x128xf32>
    %16 = tpu.matmul %1, %15, %cst_9 {dimension_numbers = #tpu.dot_dimension_numbers<[1], [0], [0], [1], [0, 0, 1, 1], [], []>} : vector<16x16xbf16>, vector<16x128xbf16>, vector<16x128xf32> -> vector<16x128xf32>
    %17 = arith.addf %0, %16 : vector<16x128xf32>
    %cst_10 = arith.constant 0.000000e+00 : f32
    %18 = vector.broadcast %cst_10 : f32 to vector<16x128xf32>
    %19 = arith.cmpf ogt, %17, %18 : vector<16x128xf32>
    %cst_11 = arith.constant -1.000000e+00 : f32
    %cst_12 = arith.constant 1.000000e+00 : f32
    %20 = vector.broadcast %cst_11 : f32 to vector<16x128xf32>
    %21 = vector.broadcast %cst_12 : f32 to vector<16x128xf32>
    %22 = arith.select %19, %20, %21 : vector<16x128xi1>, vector<16x128xf32>
    %23 = arith.truncf %22 : vector<16x128xf32> to vector<16x128xbf16>
    %cst_13 = arith.constant dense<0.000000e+00> : vector<16x128xf32>
    %24 = tpu.matmul %1, %23, %cst_13 {dimension_numbers = #tpu.dot_dimension_numbers<[1], [0], [0], [1], [0, 0, 1, 1], [], []>} : vector<16x16xbf16>, vector<16x128xbf16>, vector<16x128xf32> -> vector<16x128xf32>
    %25 = arith.addf %0, %24 : vector<16x128xf32>
    %cst_14 = arith.constant 0.000000e+00 : f32
    %26 = vector.broadcast %cst_14 : f32 to vector<16x128xf32>
    %27 = arith.cmpf ogt, %25, %26 : vector<16x128xf32>
    %cst_15 = arith.constant -1.000000e+00 : f32
    %cst_16 = arith.constant 1.000000e+00 : f32
    %28 = vector.broadcast %cst_15 : f32 to vector<16x128xf32>
    %29 = vector.broadcast %cst_16 : f32 to vector<16x128xf32>
    %30 = arith.select %27, %28, %29 : vector<16x128xi1>, vector<16x128xf32>
    %31 = arith.truncf %30 : vector<16x128xf32> to vector<16x128xbf16>
    %cst_17 = arith.constant dense<0.000000e+00> : vector<16x128xf32>
    %32 = tpu.matmul %1, %31, %cst_17 {dimension_numbers = #tpu.dot_dimension_numbers<[1], [0], [0], [1], [0, 0, 1, 1], [], []>} : vector<16x16xbf16>, vector<16x128xbf16>, vector<16x128xf32> -> vector<16x128xf32>
    %33 = arith.addf %0, %32 : vector<16x128xf32>
    %cst_18 = arith.constant 0.000000e+00 : f32
    %34 = vector.broadcast %cst_18 : f32 to vector<16x128xf32>
    %35 = arith.cmpf ogt, %33, %34 : vector<16x128xf32>
    %cst_19 = arith.constant -1.000000e+00 : f32
    %cst_20 = arith.constant 1.000000e+00 : f32
    %36 = vector.broadcast %cst_19 : f32 to vector<16x128xf32>
    %37 = vector.broadcast %cst_20 : f32 to vector<16x128xf32>
    %38 = arith.select %35, %36, %37 : vector<16x128xi1>, vector<16x128xf32>
    %39 = arith.truncf %38 : vector<16x128xf32> to vector<16x128xbf16>
    %cst_21 = arith.constant dense<0.000000e+00> : vector<16x128xf32>
    %40 = tpu.matmul %1, %39, %cst_21 {dimension_numbers = #tpu.dot_dimension_numbers<[1], [0], [0], [1], [0, 0, 1, 1], [], []>} : vector<16x16xbf16>, vector<16x128xbf16>, vector<16x128xf32> -> vector<16x128xf32>
    %41 = arith.mulf %0, %38 : vector<16x128xf32>
    %cst_22 = arith.constant 5.000000e-01 : f32
    %42 = vector.broadcast %cst_22 : f32 to vector<16x128xf32>
    %43 = arith.mulf %42, %38 : vector<16x128xf32>
    %44 = arith.mulf %43, %40 : vector<16x128xf32>
    %45 = arith.addf %41, %44 : vector<16x128xf32>
    %cst_23 = arith.constant dense<0.000000e+00> : vector<128xf32>
    %46 = vector.multi_reduction <add>, %45, %cst_23 [0] : vector<16x128xf32> to vector<128xf32>
    %47 = vector.shape_cast %46 : vector<128xf32> to vector<1x128xf32>
    %c0_24 = arith.constant 0 : index
    %c0_25 = arith.constant 0 : index
    %48 = memref.load %arg3[%c0_24, %c0_25] : memref<1x1xf32, #tpu.memory_space<smem>>
    %49 = vector.broadcast %48 : f32 to vector<1x128xf32>
    %50 = arith.mulf %49, %47 : vector<1x128xf32>
    %c0_26 = arith.constant 0 : index
    %c0_27 = arith.constant 0 : index
    %51 = memref.load %arg4[%c0_26, %c0_27] : memref<1x1xf32, #tpu.memory_space<smem>>
    %52 = vector.broadcast %51 : f32 to vector<1x128xf32>
    %53 = arith.addf %50, %52 : vector<1x128xf32>
    %c0_28 = arith.constant 0 : index
    %c0_29 = arith.constant 0 : index
    %54 = vector.load %arg5[%c0_28, %c0_29] : memref<1x128xf32, #tpu.memory_space<vmem>>, vector<1x128xf32>
    tpu.vector_store %arg5[%c0_28, %c0_29], %53 {strides = array<i32>} : memref<1x128xf32, #tpu.memory_space<vmem>>, vector<1x128xf32>,
    return
  }
  func.func @transform_0(%arg0: i32) -> (i32, i32) {
    %c0_i32 = arith.constant 0 : i32
    %c0_i32_0 = arith.constant 0 : i32
    return %c0_i32, %arg0 : i32, i32
  }
  func.func @transform_1(%arg0: i32) -> (i32, i32) {
    %c0_i32 = arith.constant 0 : i32
    %c0_i32_0 = arith.constant 0 : i32
    %c0_i32_1 = arith.constant 0 : i32
    return %c0_i32, %c0_i32_0 : i32, i32
  }
  func.func @transform_2(%arg0: i32) -> (i32, i32) {
    %c0_i32 = arith.constant 0 : i32
    %c0_i32_0 = arith.constant 0 : i32
    %c0_i32_1 = arith.constant 0 : i32
    return %c0_i32, %c0_i32_0 : i32, i32
  }
  func.func @transform_3(%arg0: i32) -> (i32, i32) {
    %c0_i32 = arith.constant 0 : i32
    %c0_i32_0 = arith.constant 0 : i32
    %c0_i32_1 = arith.constant 0 : i32
    return %c0_i32, %c0_i32_0 : i32, i32
  }
  func.func @transform_4(%arg0: i32) -> (i32, i32) {
    %c0_i32 = arith.constant 0 : i32
    %c0_i32_0 = arith.constant 0 : i32
    return %c0_i32, %arg0 : i32, i32
  }
}

</mosaic_0001>

<bundles_post_ra>
// kernel: full_ising_forward.2
= control target key start
LH: loop header
LB: loop body
LE: loop exit
PB: predicated region body
PF: predicated region fallthrough
CT: control target
= control target key end

     0   :  { %s658_s0 = inlined_call_operand.vmem [shape: bf16[16,16], index: 0, kind: input, shape index: {}]   ;;  %s659_s1 = inlined_call_operand.<no memory space> [shape: f32[1,1], index: 1, kind: input, shape index: {}]   ;;  %s660_s2 = inlined_call_operand.<no memory space> [shape: f32[1,1], index: 2, kind: input, shape index: {}]   ;;  %s661_s3 = inlined_call_operand.vmem [shape: f32[256,16], index: 3, kind: input, shape index: {}]   ;;  %s662_s4 = inlined_call_operand.hbm [shape: f32[1,256], index: 4, kind: output, shape index: {}]  }
   0x1   :  { %9 = sst [smem:[#allocation2]] %s659_s1 }
   0x2   :  { %10 = sst [smem:[#allocation3]] %s660_s2 }
   0x3   :  { %11 = vsyncpa [#allocation5], 0 }
   0x4   :  { %13 = vsyncpa [#allocation5 + $0x1], 0  ;;  %s565_s19 = smov 0   ;;  %s567_s20 = smov 0  }
   0x5   :  { %s569_s21 = smov 0   ;;  %s571_s22 = smov 0  }
   0x6 LB: > { %s586_s1 = sadd.s32 4294967295, %s531_s22   ;;  %s411_s2 = sadd.s32 4294967294, %s531_s22   ;;  %s531_s22 = sphi %s571_s22, %s668_s22   ;;  %s527_s21 = sphi %s569_s21, %s667_s21   ;;  %s523_s20 = sphi %s567_s20, %s666_s20   ;;  %s519_s19 = sphi %s565_s19, %s665_s19  }
   0x7   : > { %s590_s23 = sadd.s32 1, %s531_s22   ;;  %s115_s24 = sadd.s32 1, %s527_s21 }
   0x8   : > { %s112_s25 = ssub.s32 %s531_s22, %s590_s23  ;;  %p125_p0 = scmp.ne.s32.totalorder %s527_s21, %s523_s20 }
   0x9   : > { %p113_p1 = scmp.eq.s32.totalorder %s112_s25, 0  ;;  %p126_p2 = scmp.eq.s32.totalorder %s586_s1, 1 }
   0xa   : > { %p131_p3 = scmp.ne.s32.totalorder %s523_s20, %s519_s19  ;;  %p132_p4 = scmp.eq.s32.totalorder %s411_s2, 1 }
   0xb   : > { %s601_s26 = scalar_select %p113_p1, %s527_s21, %s115_s24  }
   0xc   : > { %p603_p5 = por %p126_p2, %p125_p0  ;;  %p607_p6 = por %p132_p4, %p131_p3 }
   0xd   : > { %p414_p7 = scmp.ge.s32.totalorder %s531_s22, 1  ;;  %p166_p8 = scmp.lt.s32.totalorder %s531_s22, 3 }
   0xf   : > { %p167_p9 = pnand %p414_p7, %p166_p8 }
  0x10   : > { %p190_p10 = scmp.lt.s32.totalorder (!%p167_p9), %s586_s1, 1  ;;  %s336_s10 = sld [smem:[#allocation2]] (!%p167_p9) }
  0x11   : > { %170 = sbr.rel (%p167_p9) target bundleno = 777 (0x309), region = 36  ;;  %s339_s11 = sld [smem:[#allocation3]] (!%p167_p9) }
  0x12   : > { %s188_s12 = sand.u32 (!%p167_p9), 1, %s523_s20   ;;  %s352_s15 = scalar_lea.hbm (!%p167_p9), %s662_s4, %s586_s1 }
  0x13   : > { %s189_s16 = scalar_lea.vmem (!%p167_p9), [#allocation4], %s188_s12  ;;  %s356_s18 = sshll.u32 (!%p167_p9), %s352_s15, 4  ;;  %s357_s18 = int_to_ptr.hbm [resolvable:$true] %s356_s18 }
  0x14   : > { %s354_s17 = sshll.u32 (!%p167_p9), %s189_s16, 4  ;;  %s344_s2 = scalar_lea.sflag (!%p167_p9), [#allocation5], %s188_s12  ;;  %s355_s17 = int_to_ptr.vmem [resolvable:$true] %s354_s17 }
  0x15   : > { %s483_s24 = sshra.s32 (!%p167_p9), %s357_s18, 4  ;;  %s484_s24 = int_to_ptr.hbm [resolvable:$true] %s483_s24 }
  0x16   : > { %s191_s29 = scalar_select %p190_p10, %s586_s1, 1  ;;  %v533_v2 = vmov 1.0   ;;  %v428_v6 = vld [vmem:[%s658_s0] sm:$0xff]  ;;  %vm219_vm2 = vcmask 130048   ;;  %v337_v51 = vstv %s336_s10 }
  0x17   : > { %v340_v53 = vstv %s339_s11  ;;  %s485_s25 = scalar_lea.hbm %s484_s24, 1  ;;  %p490_p0 = scmp.lt.s32.totalorder %s484_s24, %s662_s4 }
  0x18   : > { %s415_s30 = sshll.u32 %s191_s29, 3  ;;  %p486_p11 = scmp.ne.s32.totalorder %s484_s24, %s485_s25 }
  0x19   : > { %s193_s7 = scalar_lea.vmem %s661_s3, %s415_s30  ;;  %s489_s30 = scalar_lea.hbm %s662_s4, 2 }
  0x1a   : > { %v194_v0 = vld [vmem:[%s193_s7] sm:$0xff]  ;;  %v416_v1 = vld [vmem:[%s193_s7 + $0x10] sm:$0xff]  ;;  %p487_p12 = pnand %p486_p11, %p603_p5  ;;  %p491_p1 = scmp.lt.s32.totalorder %s489_s30, %s485_s25 }
  0x1b   : > { %vm209_vm0 = vcmp.gt.f32.partialorder %v194_v0, 0.0  ;;  %vm210_vm1 = vcmp.gt.f32.partialorder %v416_v1, 0.0 }
  0x1c   : > { %v211_v3 = vsel %vm209_vm0, -1.0, %v533_v2  ;;  %v212_v4 = vsel %vm210_vm1, -1.0, %v533_v2  ;;  %p488_p13 = pneg %p487_p12  ;;  %p492_p2 = por %p491_p1, %p490_p0 }
  0x1d   : > { %v213_v5 = vpack.c.bf16 %v212_v4, %v211_v3 }
  0x1e   : > { %p493_p3 = pnand %p492_p2, %p488_p13 }
  0x1f   : > { %230 = vmatpush.bf16.msra.mxu0 %v213_v5 }
  0x22   : > { %421 = vmatmul.msk.bf16.vlgmr.msra.gmra.mxu0 %vm219_vm2, %v428_v6 }
  0x9f   : > { %v232_v7 = vpop.f32.mrf.mxu0 }
  0xa0   : > { %v237_v8 = vadd.f32 %v232_v7, %v194_v0 }
  0xa2   : > { %vm239_vm3 = vcmp.gt.f32.partialorder %v237_v8, 0.0 }
  0xa3   : > { %v241_v11 = vsel %vm239_vm3, -1.0, %v533_v2 }
  0xa7   : > { %v234_v9 = vpop.f32.mrf.mxu0 }
  0xa8   : > { %v238_v10 = vadd.f32 %v416_v1, %v234_v9 }
  0xaa   : > { %vm240_vm4 = vcmp.gt.f32.partialorder %v238_v10, 0.0 }
  0xab   : > { %v242_v12 = vsel %vm240_vm4, -1.0, %v533_v2 }
  0xac   : > { %v243_v13 = vpack.c.bf16 %v242_v12, %v241_v11 }
  0xae   : > { %251 = vmatpush.bf16.msra.mxu1 %v243_v13 }
  0xb1   : > { %422 = vmatmul.msk.bf16.vlgmr.msra.gmra.mxu1 %vm219_vm2, %v428_v6 }
 0x12e   : > { %v253_v14 = vpop.f32.mrf.mxu1 }
 0x12f   : > { %v258_v15 = vadd.f32 %v253_v14, %v194_v0 }
 0x131   : > { %vm260_vm5 = vcmp.gt.f32.partialorder %v258_v15, 0.0 }
 0x132   : > { %v262_v18 = vsel %vm260_vm5, -1.0, %v533_v2 }
 0x136   : > { %v255_v16 = vpop.f32.mrf.mxu1 }
 0x137   : > { %v259_v17 = vadd.f32 %v416_v1, %v255_v16 }
 0x139   : > { %vm261_vm6 = vcmp.gt.f32.partialorder %v259_v17, 0.0 }
 0x13a   : > { %v263_v19 = vsel %vm261_vm6, -1.0, %v533_v2 }
 0x13b   : > { %v264_v20 = vpack.c.bf16 %v263_v19, %v262_v18 }
 0x13d   : > { %272 = vmatpush.bf16.msra.mxu2 %v264_v20 }
 0x140   : > { %423 = vmatmul.msk.bf16.vlgmr.msra.gmra.mxu2 %vm219_vm2, %v428_v6 }
 0x1c3   : > { %v274_v21 = vpop.f32.mrf.mxu2 }
 0x1c4   : > { %v279_v22 = vadd.f32 %v274_v21, %v194_v0 }
 0x1c6   : > { %vm281_vm7 = vcmp.gt.f32.partialorder %v279_v22, 0.0 }
 0x1c7   : > { %v283_v25 = vsel %vm281_vm7, -1.0, %v533_v2 }
 0x1cb   : > { %v276_v23 = vpop.f32.mrf.mxu2 }
 0x1cc   : > { %v280_v24 = vadd.f32 %v416_v1, %v276_v23 }
 0x1ce   : > { %vm282_vm8 = vcmp.gt.f32.partialorder %v280_v24, 0.0 }
 0x1cf   : > { %v284_v26 = vsel %vm282_vm8, -1.0, %v533_v2 }
 0x1d0   : > { %v285_v27 = vpack.c.bf16 %v284_v26, %v283_v25 }
 0x1d2   : > { %293 = vmatpush.bf16.msra.mxu3 %v285_v27 }
 0x1d5   : > { %424 = vmatmul.msk.bf16.vlgmr.msra.gmra.mxu3 %vm219_vm2, %v428_v6 }
 0x258   : > { %v295_v28 = vpop.f32.mrf.mxu3 }
 0x259   : > { %v300_v29 = vadd.f32 %v295_v28, %v194_v0 }
 0x25b   : > { %vm302_vm9 = vcmp.gt.f32.partialorder %v300_v29, 0.0 }
 0x25c   : > { %v304_v32 = vsel %vm302_vm9, -1.0, %v533_v2 }
 0x25d   : > { %v323_v36 = vmul.f32 0.5, %v304_v32  ;;  %v321_v40 = vmul.f32 %v304_v32, %v194_v0 }
 0x260   : > { %v297_v30 = vpop.f32.mrf.mxu3 }
 0x261   : > { %v301_v31 = vadd.f32 %v416_v1, %v297_v30 }
 0x263   : > { %vm303_vm10 = vcmp.gt.f32.partialorder %v301_v31, 0.0 }
 0x264   : > { %v305_v33 = vsel %vm303_vm10, -1.0, %v533_v2 }
 0x265   : > { %v306_v34 = vpack.c.bf16 %v305_v33, %v304_v32  ;;  %v324_v38 = vmul.f32 0.5, %v305_v33  ;;  %v322_v41 = vmul.f32 %v416_v1, %v305_v33 }
 0x267   : > { %314 = vmatpush.bf16.msrb.mxu0 %v306_v34 }
 0x26a   : > { %425 = vmatmul.msk.bf16.vlgmr.msrb.gmra.mxu0 %vm219_vm2, %v428_v6 }
 0x2e7   : > { %v316_v35 = vpop.f32.mrf.mxu0 }
 0x2e8   : > { %v325_v37 = vmul.f32 %v323_v36, %v316_v35 }
 0x2ea   : > { %v327_v43 = vadd.f32 %v325_v37, %v321_v40 }
 0x2ef   : > { %v318_v39 = vpop.f32.mrf.mxu0 }
 0x2f0   : > { %v326_v42 = vmul.f32 %v324_v38, %v318_v39 }
 0x2f2   : > { %v328_v44 = vadd.f32 %v326_v42, %v322_v41 }
 0x2f4   : > { %v329_v45 = vadd.f32 %v328_v44, %v327_v43 }
 0x2f6   : > { %v330_v46 = vrot.slane %v329_v45, 4 }
 0x2f8   : > { %v331_v47 = vadd.f32 %v330_v46, %v329_v45 }
 0x2fa   : > { %v332_v48 = vrot.slane %v331_v47, 2 }
 0x2fc   : > { %v333_v49 = vadd.f32 %v332_v48, %v331_v47 }
 0x2fe   : > { %v334_v50 = vrot.slane %v333_v49, 1 }
 0x300   : > { %v335_v52 = vadd.f32 %v334_v50, %v333_v49 }
 0x302   : > { %v338_v54 = vmul.f32 %v337_v51, %v335_v52 }
 0x304   : > { %v341_v55 = vadd.f32 %v340_v53, %v338_v54 }
 0x306   : > { %342 = vst [vmem:[%s189_s16] sm:$0x1] %v341_v55 }
 0x307   : > { %496 = shalt.err (!%p493_p3)
}
 0x308   : > { %429 = dma.vmem_to_hbm [thread:$0]  (%p603_p5), %s355_s17, 16, %s357_s18, %s344_s2  }
 0x309 PF: > { %p435_p4 = scmp.ge.s32.totalorder %s531_s22, 2  ;;  %s368_s7 = sand.u32 1, %s519_s19  }
 0x30a   : > { %s369_s8 = scalar_lea.sflag [#allocation5], %s368_s7 }
 0x30b   : > { %p432_p7 = pnand %p435_p4, %p607_p6 }
 0x30d   : > { %p433_p8 = pneg %p432_p7 }
 0x30f   : > { %514 = dma.done.wait (%p433_p8), %s369_s8, 16  }
 0x310   : > { %516 = vsyncadd (%p433_p8), %s369_s8, 4294967280  ;;  %p16_p9 = scmp.ge.s32.totalorder %s590_s23, 4   ;;  %s665_s19 = smov %s523_s20 }
 0x311   : > { %s666_s20 = smov %s527_s21  ;;  %s667_s21 = smov %s601_s26 }
 0x312   : > { %s668_s22 = smov %s590_s23  ;;  %18 = sbr.rel (!%p16_p9) target bundleno = 6 (0x6), region = 73 }
 0x317   :  { %374 = vsyncpa [#allocation5], 1 }
 0x318   :  { %376 = vsyncpa [#allocation5 + $0x1], 1 }

</bundles_post_ra>
